<compile_context>
chip_gen: v6e
topology: v6e:2x2x1
jax: 0.10.0
libtpu: 0.0.40
codegen_flags: <defaults>
</compile_context>

<pallas_src>
import functools

import jax
import jax.numpy as jnp
from jax.experimental import pallas as pl
from jax.experimental.pallas import tpu as pltpu


def _attention_kernel(x_ref, wqkv_ref, wproj_ref, bias_ref, o_ref, *,
                      num_heads, n_valid, approx_recip):
    # x_ref:     (bB, Np, C)   compute dtype (bf16 or f32)
    # wqkv_ref:  (C, 3C)       compute dtype; columns ordered [q|k|v] x head x
    #                          head_dim, qk scale pre-folded into q columns
    # wproj_ref: (C, Op)       compute dtype
    # bias_ref:  (1, Op)       f32
    # o_ref:     (bB, Np, Op)
    bB, Np, C = x_ref.shape
    H = num_heads
    D = C // H
    Op = o_ref.shape[-1]
    BN = bB * Np

    x2 = x_ref[...].reshape(BN, C)              # leading-dim merge only (free)
    cdt = x2.dtype

    # ---- fused QKV projection: ONE lane-dense (BN, C) @ (C, 3C) MXU matmul,
    #      f32 accumulation.  The qk scale is already folded into the weight.
    qkv = jnp.dot(x2, wqkv_ref[...], preferred_element_type=jnp.float32)
    qkv = qkv.astype(cdt)                       # (BN, 3C)

    # ---- per-head attention core (static head loop; softmax math in f32).
    # Static lane slices of the fused output; no broadcasts, no transposes.
    ctx_heads = []
    for h in range(H):
        q = qkv[:, h * D:(h + 1) * D].reshape(bB, Np, D)
        k = qkv[:, C + h * D:C + (h + 1) * D].reshape(bB, Np, D)
        v = qkv[:, 2 * C + h * D:2 * C + (h + 1) * D].reshape(bB, Np, D)

        logits = jnp.einsum('bnd,bmd->bnm', q, k,
                            preferred_element_type=jnp.float32)   # (bB, Np, Np)
        if n_valid < Np:
            # Mask padded key columns (compile-time branch: n_valid is static).
            kpos = jax.lax.broadcasted_iota(jnp.int32, logits.shape, 2)
            logits = jnp.where(kpos < n_valid, logits, -jnp.inf)

        m = jnp.max(logits, axis=-1, keepdims=True)
        e = jnp.exp(logits - m)
        denom = jnp.sum(e, axis=-1, keepdims=True)
        p = e * pl.reciprocal(denom, approx=approx_recip)
        # attn_drop is Dropout(p=0.0) -> identity.

        ctx = jnp.einsum('bnm,bmd->bnd', p.astype(cdt), v,
                         preferred_element_type=jnp.float32)      # (bB, Np, D)
        ctx_heads.append(ctx.astype(cdt).reshape(BN, D))

    # ---- output projection: concat heads along lanes, then ONE C-deep
    #      (BN, C) @ (C, Op) matmul -- head reduction rides the MXU contraction.
    ctx_cat = ctx_heads[0] if H == 1 else jnp.concatenate(ctx_heads, axis=-1)
    y = jnp.dot(ctx_cat, wproj_ref[...], preferred_element_type=jnp.float32)
    y = y + bias_ref[0]                         # proj bias; proj_drop(0.0) -> id
    o_ref[...] = y.reshape(bB, Np, Op).astype(o_ref.dtype)


def _largest_divisor_le(n, upper):
    upper = max(1, min(int(upper), int(n)))
    for d in range(upper, 0, -1):
        if n % d == 0:
            return d
    return 1


def _step_vmem_bytes(bB, Np, C, Op, H, cbytes, obytes):
    """Rough per-grid-step live VMEM footprint (double-buffered I/O blocks,
    fused-qkv intermediate, ~2 heads of softmax scratch, concat ctx, f32 out)."""
    f32 = 4
    D = C // H
    b = 0
    b += 2 * bB * Np * C * cbytes                      # x block (double-buffered)
    b += 2 * bB * Np * Op * obytes                     # out block (double-buffered)
    b += 2 * (C * 3 * C + C * Op) * cbytes + 2 * Op * f32   # weights + bias
    b += bB * Np * 3 * C * (f32 + cbytes)              # fused qkv accum + cast
    b += 2 * bB * Np * Np * (2 * f32 + cbytes)         # ~2 heads of logits/exp/p
    b += bB * Np * (C * cbytes + D * f32)              # concat ctx + one f32 ctx
    b += bB * Np * Op * f32                            # projected f32 pre-cast
    return b


def attention_forward(x, w_qkv, w_proj, b_proj, *, num_heads, qk_scale=None,
                      batch_block=None, compute_dtype=jnp.bfloat16):
    """Forward pass of the PyTorch Attention module via a Pallas TPU kernel.

    x:      (B, N, C)
    w_qkv:  (3C, C)      -- nn.Linear(dim, 3*dim, bias=False).weight
    w_proj: (out_dim, C) -- nn.Linear(dim, out_dim).weight
    b_proj: (out_dim,)   -- nn.Linear(dim, out_dim).bias
    """
    B, N, C = x.shape
    H = num_heads
    D = C // H
    out_dim = w_proj.shape[0]
    scale = float(qk_scale) if qk_scale is not None else D ** -0.5
    out_dtype = x.dtype
    cdt = jnp.dtype(compute_dtype)
    cbytes = cdt.itemsize
    obytes = jnp.dtype(out_dtype).itemsize

    # Lane-dense output columns (unmasked stores); sliced back after the call.
    Op = ((out_dim + 127) // 128) * 128
    # Sequence padded to the sublane tile; padded keys masked in-kernel.
    n_align = 16 if cdt == jnp.dtype(jnp.bfloat16) else 8
    Np = ((N + n_align - 1) // n_align) * n_align

    # ---- VMEM budget / grid selection (generation-aware) ----
    try:
        vmem_cap = int(pltpu.get_tpu_info().vmem_capacity_bytes)
    except Exception:
        vmem_cap = 64 * 1024 * 1024          # v7x per-core VMEM: tightest case
    vmem_limit = int(vmem_cap * 0.75)
    budget = int(vmem_limit * 0.8)

    if batch_block is None:
        # >=2 grid steps: gives the BlockSpec pipeline DMA to overlap and lets
        # the "parallel" batch axis shard across v7x's two TensorCores; shrink
        # until the per-step working set fits the VMEM budget.
        bB = _largest_divisor_le(B, max(1, B // 2))
        while bB > 1 and _step_vmem_bytes(bB, Np, C, Op, H, cbytes, obytes) > budget:
            bB = _largest_divisor_le(B, bB - 1)
    else:
        bB = max(1, min(int(batch_block), B))
    nb = pl.cdiv(B, bB)

    # ---- one-time host-side weight re-layout (no in-kernel transposes) ----
    # PyTorch qkv weight rows are ordered [q|k|v] x head x head_dim; transpose
    # to (C, 3C) and fold the qk scale into the q columns (qkv has no bias).
    w_qkv_t = jnp.asarray(w_qkv, jnp.float32).T                      # (C, 3C)
    col_scale = jnp.concatenate([jnp.full((C,), scale, jnp.float32),
                                 jnp.ones((2 * C,), jnp.float32)])
    w_qkv_t = (w_qkv_t * col_scale[None, :]).astype(cdt)

    w_proj_t = jnp.asarray(w_proj, jnp.float32).T                    # (C, out)
    bias = jnp.asarray(b_proj, jnp.float32)
    if Op != out_dim:
        w_proj_t = jnp.pad(w_proj_t, ((0, 0), (0, Op - out_dim)))
        bias = jnp.pad(bias, (0, Op - out_dim))
    w_proj_t = w_proj_t.astype(cdt)
    bias2d = bias.reshape(1, Op).astype(jnp.float32)

    x_c = x.astype(cdt)
    if Np != N:
        x_c = jnp.pad(x_c, ((0, 0), (0, Np - N), (0, 0)))

    approx = (cdt == jnp.dtype(jnp.bfloat16))
    kernel = functools.partial(_attention_kernel, num_heads=H, n_valid=N,
                               approx_recip=approx)

    out = pl.pallas_call(
        kernel,
        out_shape=jax.ShapeDtypeStruct((B, Np, Op), out_dtype),
        grid_spec=pltpu.PrefetchScalarGridSpec(
            num_scalar_prefetch=0,
            grid=(nb,),
            in_specs=[
                pl.BlockSpec((bB, Np, C), lambda b: (b, 0, 0)),     # x
                pl.BlockSpec((C, 3 * C), lambda b: (0, 0)),         # qkv weight
                pl.BlockSpec((C, Op), lambda b: (0, 0)),            # proj weight
                pl.BlockSpec((1, Op), lambda b: (0, 0)),            # proj bias
            ],
            out_specs=pl.BlockSpec((bB, Np, Op), lambda b: (b, 0, 0)),
        ),
        compiler_params=pltpu.CompilerParams(
            dimension_semantics=("parallel",),
            vmem_limit_bytes=vmem_limit),
    )(x_c, w_qkv_t, w_proj_t, bias2d)

    if Np != N or Op != out_dim:
        out = out[:, :N, :out_dim]
    return out


def attention_reference(x, w_qkv, w_proj, b_proj, *, num_heads, qk_scale=None):
    """Plain-JAX replica of the PyTorch forward for verification."""
    B, N, C = x.shape
    D = C // num_heads
    scale = qk_scale if qk_scale is not None else D ** (-0.5)
    qkv = jnp.einsum('bnc,oc->bno', x, w_qkv)                # (B, N, 3C)
    qkv = qkv.reshape(B, N, 3, num_heads, D).transpose(2, 0, 3, 1, 4)
    q, k, v = qkv[0], qkv[1], qkv[2]                          # (B, H, N, D)
    attn = jnp.einsum('bhnd,bhmd->bhnm', q, k) * scale
    attn = jax.nn.softmax(attn, axis=-1)
    out = jnp.einsum('bhnm,bhmd->bhnd', attn, v)              # (B, H, N, D)
    out = out.transpose(0, 2, 1, 3).reshape(B, N, C)
    return jnp.einsum('bnc,oc->bno', out, w_proj) + b_proj


if __name__ == "__main__":
    # Small shapes consistent with the module's forward pass.
    B, N, C = 2, 8, 32
    num_heads = 4          # head_dim = 8
    out_dim = C            # out_dim defaults to dim

    key = jax.random.PRNGKey(0)
    k1, k2, k3, k4 = jax.random.split(key, 4)

    x = jax.random.normal(k1, (B, N, C), dtype=jnp.float32)
    # qkv: nn.Linear(dim, 3*dim, bias=False) -> weight (3C, C)
    w_qkv = jax.random.normal(k2, (3 * C, C), dtype=jnp.float32) * (C ** -0.5)
    # proj: nn.Linear(dim, out_dim) -> weight (out_dim, C), bias (out_dim,)
    w_proj = jax.random.normal(k3, (out_dim, C), dtype=jnp.float32) * (C ** -0.5)
    b_proj = jax.random.normal(k4, (out_dim,), dtype=jnp.float32) * 0.01

    ref = attention_reference(x, w_qkv, w_proj, b_proj, num_heads=num_heads)

    # f32 compute path, aligned N: tight check of kernel structure / math.
    out_f32 = attention_forward(x, w_qkv, w_proj, b_proj, num_heads=num_heads,
                                compute_dtype=jnp.float32)
    out_f32 = jax.block_until_ready(out_f32)
    assert out_f32.shape == (B, N, out_dim)
    assert jnp.allclose(out_f32, ref, atol=1e-4, rtol=1e-4), "f32 mismatch"

    # Odd sequence length: exercises N padding + -inf key masking (f32, tight).
    N2 = 13
    x2 = jax.random.normal(k1, (B, N2, C), dtype=jnp.float32)
    ref2 = attention_reference(x2, w_qkv, w_proj, b_proj, num_heads=num_heads)
    out2 = attention_forward(x2, w_qkv, w_proj, b_proj, num_heads=num_heads,
                             compute_dtype=jnp.float32)
    out2 = jax.block_until_ready(out2)
    assert out2.shape == (B, N2, out_dim)
    assert jnp.allclose(out2, ref2, atol=1e-4, rtol=1e-4), "padded-N mismatch"

    # bf16 MXU fast path (default): looser tolerance for bf16 operands.
    out_bf16 = attention_forward(x, w_qkv, w_proj, b_proj, num_heads=num_heads)
    out_bf16 = jax.block_until_ready(out_bf16)
    assert out_bf16.shape == (B, N, out_dim)
    assert jnp.allclose(out_bf16, ref, atol=1e-1, rtol=1e-1), "bf16 mismatch"

    print("KERNEL_OK")
</pallas_src>

<mosaic_0001>
module attributes {stable_mosaic.version = 11 : i64} {
  func.func @_attention_kernel(%arg0: i32, %arg1: memref<1x8x32xf32, #tpu.memory_space<vmem>>, %arg2: memref<32x96xf32, #tpu.memory_space<vmem>>, %arg3: memref<32x128xf32, #tpu.memory_space<vmem>>, %arg4: memref<1x128xf32, #tpu.memory_space<vmem>>, %arg5: memref<1x8x128xf32, #tpu.memory_space<vmem>>) attributes {dimension_semantics = [#tpu.dimension_semantics<parallel>], iteration_bounds = array<i64: 2>, scalar_prefetch = 0 : i64, scratch_operands = 0 : i64, tpu.core_type = #tpu.core_type<tc>, window_params = [{transform_indices = @transform_0, window_bounds = array<i64: 1, 8, 32>}, {pipeline_mode = #tpu.pipeline_mode<synchronous>, transform_indices = @transform_1, window_bounds = array<i64: 32, 96>}, {pipeline_mode = #tpu.pipeline_mode<synchronous>, transform_indices = @transform_2, window_bounds = array<i64: 32, 128>}, {pipeline_mode = #tpu.pipeline_mode<synchronous>, transform_indices = @transform_3, window_bounds = array<i64: 1, 128>}, {transform_indices = @transform_4, window_bounds = array<i64: 1, 8, 128>}]} {
    %c0 = arith.constant 0 : index
    %c0_0 = arith.constant 0 : index
    %c0_1 = arith.constant 0 : index
    %0 = vector.load %arg1[%c0, %c0_0, %c0_1] : memref<1x8x32xf32, #tpu.memory_space<vmem>>, vector<1x8x32xf32>
    %1 = vector.shape_cast %0 : vector<1x8x32xf32> to vector<8x32xf32>
    %c0_2 = arith.constant 0 : index
    %c0_3 = arith.constant 0 : index
    %2 = vector.load %arg2[%c0_2, %c0_3] : memref<32x96xf32, #tpu.memory_space<vmem>>, vector<32x96xf32>
    %cst = arith.constant dense<0.000000e+00> : vector<8x96xf32>
    %3 = tpu.matmul %1, %2, %cst {dimension_numbers = #tpu.dot_dimension_numbers<[1], [0], [0], [1], [0, 0, 1, 1], [], []>} : vector<8x32xf32>, vector<32x96xf32>, vector<8x96xf32> -> vector<8x96xf32>
    %4 = vector.extract_strided_slice %3 {offsets = [0, 0], sizes = [8, 8], strides = [1, 1]} : vector<8x96xf32> to vector<8x8xf32>
    %5 = vector.shape_cast %4 : vector<8x8xf32> to vector<1x8x8xf32>
    %6 = vector.extract_strided_slice %3 {offsets = [0, 32], sizes = [8, 8], strides = [1, 1]} : vector<8x96xf32> to vector<8x8xf32>
    %7 = vector.shape_cast %6 : vector<8x8xf32> to vector<1x8x8xf32>
    %8 = vector.extract_strided_slice %3 {offsets = [0, 64], sizes = [8, 8], strides = [1, 1]} : vector<8x96xf32> to vector<8x8xf32>
    %9 = vector.shape_cast %8 : vector<8x8xf32> to vector<1x8x8xf32>
    "tpu.trace_start"() <{level = 10 : i32, message = "bnd,bmd->bnm"}> : () -> ()
    %cst_4 = arith.constant dense<0.000000e+00> : vector<1x8x8xf32>
    %10 = tpu.matmul %5, %7, %cst_4 {dimension_numbers = #tpu.dot_dimension_numbers<[2], [2], [1], [1], [0, 0, 0, 1, 1, 1], [0], [0]>} : vector<1x8x8xf32>, vector<1x8x8xf32>, vector<1x8x8xf32> -> vector<1x8x8xf32>
    "tpu.trace_stop"() : () -> ()
    %cst_5 = arith.constant dense<0xFF800000> : vector<1x8xf32>
    %11 = vector.multi_reduction <maximumf>, %10, %cst_5 [2] : vector<1x8x8xf32> to vector<1x8xf32>
    %12 = vector.shape_cast %11 : vector<1x8xf32> to vector<1x8x1xf32>
    %13 = vector.broadcast %12 : vector<1x8x1xf32> to vector<1x8x8xf32>
    %14 = arith.subf %10, %13 : vector<1x8x8xf32>
    %15 = math.exp %14 : vector<1x8x8xf32>
    %cst_6 = arith.constant dense<0.000000e+00> : vector<1x8xf32>
    %16 = vector.multi_reduction <add>, %15, %cst_6 [2] : vector<1x8x8xf32> to vector<1x8xf32>
    %17 = vector.shape_cast %16 : vector<1x8xf32> to vector<1x8x1xf32>
    %18 = tpu.reciprocal %17 : vector<1x8x1xf32> -> vector<1x8x1xf32>
    %19 = vector.broadcast %18 : vector<1x8x1xf32> to vector<1x8x8xf32>
    %20 = arith.mulf %15, %19 : vector<1x8x8xf32>
    "tpu.trace_start"() <{level = 10 : i32, message = "bnm,bmd->bnd"}> : () -> ()
    %cst_7 = arith.constant dense<0.000000e+00> : vector<1x8x8xf32>
    %21 = tpu.matmul %20, %9, %cst_7 {dimension_numbers = #tpu.dot_dimension_numbers<[2], [1], [1], [2], [0, 0, 0, 1, 1, 2], [0], [0]>} : vector<1x8x8xf32>, vector<1x8x8xf32>, vector<1x8x8xf32> -> vector<1x8x8xf32>
    "tpu.trace_stop"() : () -> ()
    %22 = vector.shape_cast %21 : vector<1x8x8xf32> to vector<8x8xf32>
    %23 = vector.extract_strided_slice %3 {offsets = [0, 8], sizes = [8, 8], strides = [1, 1]} : vector<8x96xf32> to vector<8x8xf32>
    %24 = vector.shape_cast %23 : vector<8x8xf32> to vector<1x8x8xf32>
    %25 = vector.extract_strided_slice %3 {offsets = [0, 40], sizes = [8, 8], strides = [1, 1]} : vector<8x96xf32> to vector<8x8xf32>
    %26 = vector.shape_cast %25 : vector<8x8xf32> to vector<1x8x8xf32>
    %27 = vector.extract_strided_slice %3 {offsets = [0, 72], sizes = [8, 8], strides = [1, 1]} : vector<8x96xf32> to vector<8x8xf32>
    %28 = vector.shape_cast %27 : vector<8x8xf32> to vector<1x8x8xf32>
    "tpu.trace_start"() <{level = 10 : i32, message = "bnd,bmd->bnm"}> : () -> ()
    %cst_8 = arith.constant dense<0.000000e+00> : vector<1x8x8xf32>
    %29 = tpu.matmul %24, %26, %cst_8 {dimension_numbers = #tpu.dot_dimension_numbers<[2], [2], [1], [1], [0, 0, 0, 1, 1, 1], [0], [0]>} : vector<1x8x8xf32>, vector<1x8x8xf32>, vector<1x8x8xf32> -> vector<1x8x8xf32>
    "tpu.trace_stop"() : () -> ()
    %cst_9 = arith.constant dense<0xFF800000> : vector<1x8xf32>
    %30 = vector.multi_reduction <maximumf>, %29, %cst_9 [2] : vector<1x8x8xf32> to vector<1x8xf32>
    %31 = vector.shape_cast %30 : vector<1x8xf32> to vector<1x8x1xf32>
    %32 = vector.broadcast %31 : vector<1x8x1xf32> to vector<1x8x8xf32>
    %33 = arith.subf %29, %32 : vector<1x8x8xf32>
    %34 = math.exp %33 : vector<1x8x8xf32>
    %cst_10 = arith.constant dense<0.000000e+00> : vector<1x8xf32>
    %35 = vector.multi_reduction <add>, %34, %cst_10 [2] : vector<1x8x8xf32> to vector<1x8xf32>
    %36 = vector.shape_cast %35 : vector<1x8xf32> to vector<1x8x1xf32>
    %37 = tpu.reciprocal %36 : vector<1x8x1xf32> -> vector<1x8x1xf32>
    %38 = vector.broadcast %37 : vector<1x8x1xf32> to vector<1x8x8xf32>
    %39 = arith.mulf %34, %38 : vector<1x8x8xf32>
    "tpu.trace_start"() <{level = 10 : i32, message = "bnm,bmd->bnd"}> : () -> ()
    %cst_11 = arith.constant dense<0.000000e+00> : vector<1x8x8xf32>
    %40 = tpu.matmul %39, %28, %cst_11 {dimension_numbers = #tpu.dot_dimension_numbers<[2], [1], [1], [2], [0, 0, 0, 1, 1, 2], [0], [0]>} : vector<1x8x8xf32>, vector<1x8x8xf32>, vector<1x8x8xf32> -> vector<1x8x8xf32>
    "tpu.trace_stop"() : () -> ()
    %41 = vector.shape_cast %40 : vector<1x8x8xf32> to vector<8x8xf32>
    %42 = vector.extract_strided_slice %3 {offsets = [0, 16], sizes = [8, 8], strides = [1, 1]} : vector<8x96xf32> to vector<8x8xf32>
    %43 = vector.shape_cast %42 : vector<8x8xf32> to vector<1x8x8xf32>
    %44 = vector.extract_strided_slice %3 {offsets = [0, 48], sizes = [8, 8], strides = [1, 1]} : vector<8x96xf32> to vector<8x8xf32>
    %45 = vector.shape_cast %44 : vector<8x8xf32> to vector<1x8x8xf32>
    %46 = vector.extract_strided_slice %3 {offsets = [0, 80], sizes = [8, 8], strides = [1, 1]} : vector<8x96xf32> to vector<8x8xf32>
    %47 = vector.shape_cast %46 : vector<8x8xf32> to vector<1x8x8xf32>
    "tpu.trace_start"() <{level = 10 : i32, message = "bnd,bmd->bnm"}> : () -> ()
    %cst_12 = arith.constant dense<0.000000e+00> : vector<1x8x8xf32>
    %48 = tpu.matmul %43, %45, %cst_12 {dimension_numbers = #tpu.dot_dimension_numbers<[2], [2], [1], [1], [0, 0, 0, 1, 1, 1], [0], [0]>} : vector<1x8x8xf32>, vector<1x8x8xf32>, vector<1x8x8xf32> -> vector<1x8x8xf32>
    "tpu.trace_stop"() : () -> ()
    %cst_13 = arith.constant dense<0xFF800000> : vector<1x8xf32>
    %49 = vector.multi_reduction <maximumf>, %48, %cst_13 [2] : vector<1x8x8xf32> to vector<1x8xf32>
    %50 = vector.shape_cast %49 : vector<1x8xf32> to vector<1x8x1xf32>
    %51 = vector.broadcast %50 : vector<1x8x1xf32> to vector<1x8x8xf32>
    %52 = arith.subf %48, %51 : vector<1x8x8xf32>
    %53 = math.exp %52 : vector<1x8x8xf32>
    %cst_14 = arith.constant dense<0.000000e+00> : vector<1x8xf32>
    %54 = vector.multi_reduction <add>, %53, %cst_14 [2] : vector<1x8x8xf32> to vector<1x8xf32>
    %55 = vector.shape_cast %54 : vector<1x8xf32> to vector<1x8x1xf32>
    %56 = tpu.reciprocal %55 : vector<1x8x1xf32> -> vector<1x8x1xf32>
    %57 = vector.broadcast %56 : vector<1x8x1xf32> to vector<1x8x8xf32>
    %58 = arith.mulf %53, %57 : vector<1x8x8xf32>
    "tpu.trace_start"() <{level = 10 : i32, message = "bnm,bmd->bnd"}> : () -> ()
    %cst_15 = arith.constant dense<0.000000e+00> : vector<1x8x8xf32>
    %59 = tpu.matmul %58, %47, %cst_15 {dimension_numbers = #tpu.dot_dimension_numbers<[2], [1], [1], [2], [0, 0, 0, 1, 1, 2], [0], [0]>} : vector<1x8x8xf32>, vector<1x8x8xf32>, vector<1x8x8xf32> -> vector<1x8x8xf32>
    "tpu.trace_stop"() : () -> ()
    %60 = vector.shape_cast %59 : vector<1x8x8xf32> to vector<8x8xf32>
    %61 = vector.extract_strided_slice %3 {offsets = [0, 24], sizes = [8, 8], strides = [1, 1]} : vector<8x96xf32> to vector<8x8xf32>
    %62 = vector.shape_cast %61 : vector<8x8xf32> to vector<1x8x8xf32>
    %63 = vector.extract_strided_slice %3 {offsets = [0, 56], sizes = [8, 8], strides = [1, 1]} : vector<8x96xf32> to vector<8x8xf32>
    %64 = vector.shape_cast %63 : vector<8x8xf32> to vector<1x8x8xf32>
    %65 = vector.extract_strided_slice %3 {offsets = [0, 88], sizes = [8, 8], strides = [1, 1]} : vector<8x96xf32> to vector<8x8xf32>
    %66 = vector.shape_cast %65 : vector<8x8xf32> to vector<1x8x8xf32>
    "tpu.trace_start"() <{level = 10 : i32, message = "bnd,bmd->bnm"}> : () -> ()
    %cst_16 = arith.constant dense<0.000000e+00> : vector<1x8x8xf32>
    %67 = tpu.matmul %62, %64, %cst_16 {dimension_numbers = #tpu.dot_dimension_numbers<[2], [2], [1], [1], [0, 0, 0, 1, 1, 1], [0], [0]>} : vector<1x8x8xf32>, vector<1x8x8xf32>, vector<1x8x8xf32> -> vector<1x8x8xf32>
    "tpu.trace_stop"() : () -> ()
    %cst_17 = arith.constant dense<0xFF800000> : vector<1x8xf32>
    %68 = vector.multi_reduction <maximumf>, %67, %cst_17 [2] : vector<1x8x8xf32> to vector<1x8xf32>
    %69 = vector.shape_cast %68 : vector<1x8xf32> to vector<1x8x1xf32>
    %70 = vector.broadcast %69 : vector<1x8x1xf32> to vector<1x8x8xf32>
    %71 = arith.subf %67, %70 : vector<1x8x8xf32>
    %72 = math.exp %71 : vector<1x8x8xf32>
    %cst_18 = arith.constant dense<0.000000e+00> : vector<1x8xf32>
    %73 = vector.multi_reduction <add>, %72, %cst_18 [2] : vector<1x8x8xf32> to vector<1x8xf32>
    %74 = vector.shape_cast %73 : vector<1x8xf32> to vector<1x8x1xf32>
    %75 = tpu.reciprocal %74 : vector<1x8x1xf32> -> vector<1x8x1xf32>
    %76 = vector.broadcast %75 : vector<1x8x1xf32> to vector<1x8x8xf32>
    %77 = arith.mulf %72, %76 : vector<1x8x8xf32>
    "tpu.trace_start"() <{level = 10 : i32, message = "bnm,bmd->bnd"}> : () -> ()
    %cst_19 = arith.constant dense<0.000000e+00> : vector<1x8x8xf32>
    %78 = tpu.matmul %77, %66, %cst_19 {dimension_numbers = #tpu.dot_dimension_numbers<[2], [1], [1], [2], [0, 0, 0, 1, 1, 2], [0], [0]>} : vector<1x8x8xf32>, vector<1x8x8xf32>, vector<1x8x8xf32> -> vector<1x8x8xf32>
    "tpu.trace_stop"() : () -> ()
    %79 = vector.shape_cast %78 : vector<1x8x8xf32> to vector<8x8xf32>
    %80 = tpu.concatenate %22, %41, %60, %79 in 1 : vector<8x8xf32>, vector<8x8xf32>, vector<8x8xf32>, vector<8x8xf32> -> vector<8x32xf32>
    %c0_20 = arith.constant 0 : index
    %c0_21 = arith.constant 0 : index
    %81 = vector.load %arg3[%c0_20, %c0_21] : memref<32x128xf32, #tpu.memory_space<vmem>>, vector<32x128xf32>
    %cst_22 = arith.constant dense<0.000000e+00> : vector<8x128xf32>
    %82 = tpu.matmul %80, %81, %cst_22 {dimension_numbers = #tpu.dot_dimension_numbers<[1], [0], [0], [1], [0, 0, 1, 1], [], []>} : vector<8x32xf32>, vector<32x128xf32>, vector<8x128xf32> -> vector<8x128xf32>
    %c0_23 = arith.constant 0 : index
    %c0_24 = arith.constant 0 : index
    %83 = vector.load %arg4[%c0_23, %c0_24] : memref<1x128xf32, #tpu.memory_space<vmem>>, vector<1x128xf32>
    %84 = vector.shape_cast %83 : vector<1x128xf32> to vector<128xf32>
    %85 = vector.shape_cast %84 : vector<128xf32> to vector<1x128xf32>
    %86 = vector.broadcast %85 : vector<1x128xf32> to vector<8x128xf32>
    %87 = arith.addf %82, %86 : vector<8x128xf32>
    %88 = vector.shape_cast %87 : vector<8x128xf32> to vector<1x8x128xf32>
    %c0_25 = arith.constant 0 : index
    %c0_26 = arith.constant 0 : index
    %c0_27 = arith.constant 0 : index
    %89 = vector.load %arg5[%c0_25, %c0_26, %c0_27] : memref<1x8x128xf32, #tpu.memory_space<vmem>>, vector<1x8x128xf32>
    tpu.vector_store %arg5[%c0_25, %c0_26, %c0_27], %88 {strides = array<i32>} : memref<1x8x128xf32, #tpu.memory_space<vmem>>, vector<1x8x128xf32>,
    return
  }
  func.func @transform_0(%arg0: i32) -> (i32, i32, i32) {
    %c0_i32 = arith.constant 0 : i32
    %c0_i32_0 = arith.constant 0 : i32
    %c0_i32_1 = arith.constant 0 : i32
    return %arg0, %c0_i32, %c0_i32_0 : i32, i32, i32
  }
  func.func @transform_1(%arg0: i32) -> (i32, i32) {
    %c0_i32 = arith.constant 0 : i32
    %c0_i32_0 = arith.constant 0 : i32
    %c0_i32_1 = arith.constant 0 : i32
    return %c0_i32, %c0_i32_0 : i32, i32
  }
  func.func @transform_2(%arg0: i32) -> (i32, i32) {
    %c0_i32 = arith.constant 0 : i32
    %c0_i32_0 = arith.constant 0 : i32
    %c0_i32_1 = arith.constant 0 : i32
    return %c0_i32, %c0_i32_0 : i32, i32
  }
  func.func @transform_3(%arg0: i32) -> (i32, i32) {
    %c0_i32 = arith.constant 0 : i32
    %c0_i32_0 = arith.constant 0 : i32
    %c0_i32_1 = arith.constant 0 : i32
    return %c0_i32, %c0_i32_0 : i32, i32
  }
  func.func @transform_4(%arg0: i32) -> (i32, i32, i32) {
    %c0_i32 = arith.constant 0 : i32
    %c0_i32_0 = arith.constant 0 : i32
    %c0_i32_1 = arith.constant 0 : i32
    return %arg0, %c0_i32, %c0_i32_0 : i32, i32, i32
  }
}

</mosaic_0001>

<bundles_post_ra>
// kernel: tpu_custom_call.1
= control target key start
LH: loop header
LB: loop body
LE: loop exit
PB: predicated region body
PF: predicated region fallthrough
CT: control target
= control target key end

     0   :  { %9 = vsyncpa [#allocation3], 0  ;;  %s1857_s0 = inlined_call_operand.hbm [shape: f32[2,8,32], index: 0, kind: input, shape index: {}]   ;;  %s1858_s1 = inlined_call_operand.hbm [shape: f32[32,96], index: 1, kind: input, shape index: {}]   ;;  %s1859_s2 = inlined_call_operand.hbm [shape: f32[32,128], index: 2, kind: input, shape index: {}]   ;;  %s1860_s3 = inlined_call_operand.vmem [shape: f32[1,128], index: 3, kind: input, shape index: {}]   ;;  %s1861_s4 = inlined_call_operand.hbm [shape: f32[2,8,128], index: 4, kind: output, shape index: {}]  }
   0x1   :  { %11 = vsyncpa [#allocation3 + $0x1], 0 }
   0x2   :  { %12 = vsyncpa [#allocation6], 0 }
   0x3   :  { %13 = vsyncpa [#allocation4], 0 }
   0x4   :  { %15 = vsyncpa [#allocation4 + $0x1], 0  ;;  %s1603_s15 = smov 0   ;;  %s1605_s16 = smov 0  }
   0x5   :  { %s1607_s17 = smov 0   ;;  %s1609_s18 = smov 0  }
   0x6 LB: > { %s1624_s19 = sadd.s32 4294967295, %s1554_s18   ;;  %s1186_s20 = sadd.s32 4294967294, %s1554_s18   ;;  %s1554_s18 = sphi %s1609_s18, %s1883_s18   ;;  %s1550_s17 = sphi %s1607_s17, %s1882_s17   ;;  %s1546_s16 = sphi %s1605_s16, %s1881_s16   ;;  %s1542_s15 = sphi %s1603_s15, %s1880_s15  }
   0x7   : > { %p41_p0 = scmp.ne.s32.totalorder %s1546_s16, %s1542_s15  ;;  %p1862_p1 = scmp.eq.s32.totalorder %s1624_s19, 0 }
   0x8   : > { %p134_p3 = scmp.eq.s32.totalorder %s1186_s20, 1  ;;  %p1187_p5 = scmp.ge.s32.totalorder %s1554_s18, 1 }
   0x9   : > { %p1633_p4 = por %p1862_p1, %p41_p0  ;;  %p141_p7 = scmp.lt.s32.totalorder %s1554_s18, 3 }
   0xa   : > { %p1638_p6 = por %p134_p3, %p41_p0  ;;  %s1556_s24 = smov [#allocation5]  }
   0xb   : > { %s1866_s21 = scalar_select %p1633_p4, 1, 0 }
   0xc   : > { %s1867_s22 = scalar_select %p1638_p6, 1, 0 }
   0xd   : > { %p1643_p8 = pnand %p1187_p5, %p141_p7  ;;  %s153_s25 = sshll.u32 %s1556_s24, 4  ;;  %s154_s25 = int_to_ptr.vmem [resolvable:$true] %s153_s25 }
   0xe   : > { %s1557_s27 = smov [#allocation7]   ;;  %s1417_s29 = scalar_lea.vmem %s154_s25, 512 }
   0xf   : > { %s1868_s23 = scalar_select %p1643_p8, 1, 0 }
  0x10   : > { %p1317_p9 = pneg %p1643_p8  ;;  %s166_s28 = sshll.u32 %s1557_s27, 4  ;;  %s167_s28 = int_to_ptr.vmem [resolvable:$true] %s166_s28 }
  0x11   : > { %p1418_p13 = scmp.ne.s32.totalorder %s154_s25, %s1417_s29  ;;  %p1425_p5 = scmp.lt.s32.totalorder %s154_s25, %s154_s25 }
  0x12   : > { %p1652_p11 = pnand %p1317_p9, %p1862_p1  ;;  %p1426_p7 = scmp.lt.s32.totalorder %s1417_s29, %s1417_s29 }
  0x14   : > { %p1408_p12 = pneg %p1652_p11  ;;  %p1427_p10 = por %p1426_p7, %p1425_p5 }
  0x16   : > { %p1420_p0 = pnand %p1418_p13, %p1408_p12 }
  0x18   : > { %p1421_p3 = pneg %p1420_p0 }
  0x1a   : > { %p1428_p9 = pnand %p1427_p10, %p1421_p3 }
  0x1c   : > { %1431 = shalt.err (!%p1428_p9)
}
  0x1d   : > { %s1558_s30 = smov 128   ;;  %s1559_s5 = smov 8  }
  0x1e   : > { %1320 = dma.hbm_to_vmem [thread:$0]  (!%p1652_p11), %s1858_s1, 512, %s154_s25, [#allocation6], %s1558_s30, %s1558_s30, %s1559_s5  }
  0x1f   : > { %s1443_s8 = scalar_lea.vmem %s167_s28, 512  ;;  %p1451_p2 = scmp.lt.s32.totalorder %s167_s28, %s167_s28 }
  0x20   : > { %p1444_p1 = scmp.ne.s32.totalorder %s167_s28, %s1443_s8  ;;  %p1452_p6 = scmp.lt.s32.totalorder %s1443_s8, %s1443_s8 }
  0x22   : > { %p1446_p13 = pnand %p1444_p1, %p1408_p12  ;;  %p1453_p5 = por %p1452_p6, %p1451_p2 }
  0x24   : > { %p1447_p0 = pneg %p1446_p13 }
  0x26   : > { %p1454_p10 = pnand %p1453_p5, %p1447_p0 }
  0x28   : > { %1457 = shalt.err (!%p1454_p10)
}
  0x29   : > { %1323 = dma.hbm_to_vmem [thread:$0]  (!%p1652_p11), %s1859_s2, 512, %s167_s28, [#allocation6], %s1558_s30, %s1558_s30, %s1559_s5  }
  0x2a   : > { %s1675_s11 = sadd.s32 1, %s1554_s18   ;;  %s28_s12 = sadd.s32 1, %s1550_s17 }
  0x2b   : > { %s25_s13 = ssub.s32 %s1554_s18, %s1675_s11  ;;  %p35_p1 = scmp.ne.s32.totalorder %s1550_s17, %s1546_s16 }
  0x2c   : > { %p26_p2 = scmp.eq.s32.totalorder %s25_s13, 0  ;;  %p36_p6 = scmp.eq.s32.totalorder %s1554_s18, 0 }
  0x2d   : > { %p1870_p12 = scmp.eq.s32.totalorder %s1624_s19, 1  ;;  %p1334_p7 = scmp.lt.s32.totalorder %s1554_s18, 2 }
  0x2e   : > { %s1691_s20 = scalar_select %p26_p2, %s1550_s17, %s28_s12  }
  0x2f   : > { %p1685_p3 = por %p1870_p12, %p35_p1  ;;  %p37_p9 = por %p36_p6, %p35_p1 }
  0x30   : > { %s183_s24 = sand.u32 1, %s1550_s17   ;;  %s1192_s26 = sshll.u32 %s1554_s18, 7 }
  0x31   : > { %s1871_s14 = scalar_select %p1685_p3, 1, 0 }
  0x32   : > { %s1191_s25 = sshll.u32 %s183_s24, 3  ;;  %s1698_s29 = scalar_lea.hbm %s1857_s0, %s1192_s26 }
  0x33   : > { %s187_s30 = scalar_lea.vmem [#allocation2], %s1191_s25  ;;  %p1700_p11 = pnand %p1334_p7, %p37_p9 }
  0x34   : > { %s194_s5 = sshll.u32 %s187_s30, 4  ;;  %s184_s7 = scalar_lea.sflag [#allocation3], %s183_s24  ;;  %s195_s5 = int_to_ptr.vmem [resolvable:$true] %s194_s5 }
  0x35   : > { %s1458_s8 = scalar_lea.hbm %s1698_s29, 128  ;;  %p1460_p0 = pneg %p1700_p11 }
  0x36   : > { %p1459_p13 = scmp.ne.s32.totalorder %s1698_s29, %s1458_s8  ;;  %s1463_s12 = scalar_lea.hbm %s1857_s0, 256 }
  0x37   : > { %p1464_p1 = scmp.lt.s32.totalorder %s1698_s29, %s1857_s0  ;;  %p1465_p2 = scmp.lt.s32.totalorder %s1463_s12, %s1458_s8 }
  0x38   : > { %p1461_p5 = pnand %p1460_p0, %p1459_p13 }
  0x39   : > { %p1466_p6 = por %p1465_p2, %p1464_p1 }
  0x3a   : > { %p1462_p10 = pneg %p1461_p5 }
  0x3c   : > { %p1467_p12 = pnand %p1466_p6, %p1462_p10 }
  0x3e   : > { %1470 = shalt.err (!%p1467_p12)
}
  0x3f   : > { %s1471_s26 = scalar_lea.vmem %s195_s5, 128  ;;  %s1560_s24 = smov [#allocation2]  }
  0x40   : > { %p1472_p7 = scmp.ne.s32.totalorder %s195_s5, %s1471_s26  ;;  %s1476_s27 = sshll.u32 %s1560_s24, 4  ;;  %s1477_s27 = int_to_ptr.vmem [resolvable:$false] %s1476_s27 }
  0x41   : > { %s1478_s28 = scalar_lea.vmem %s1477_s27, 256  ;;  %p1479_p13 = scmp.lt.s32.totalorder %s195_s5, %s1477_s27 }
  0x42   : > { %p1474_p9 = pnand %p1472_p7, %p1460_p0  ;;  %p1480_p5 = scmp.lt.s32.totalorder %s1478_s28, %s1471_s26 }
  0x44   : > { %p1475_p3 = pneg %p1474_p9  ;;  %p1481_p4 = por %p1480_p5, %p1479_p13 }
  0x46   : > { %p1482_p8 = pnand %p1481_p4, %p1475_p3 }
  0x48   : > { %1485 = shalt.err (!%p1482_p8)
}
  0x49   : > { %1327 = dma.hbm_to_vmem [thread:$0]  (!%p1700_p11), %s1698_s29, 128, %s195_s5, %s184_s7  }
  0x4a   : > { %p1873_p10 = scmp.ne.s32.totalorder %s1868_s23, 0 }
  0x4b   : > { %s1721_s30 = sand.u32 (!%p1873_p10), 1, %s1546_s16   ;;  %p1874_p4 = scmp.ne.s32.totalorder (!%p1873_p10), %s1866_s21, 0 }
  0x4c   : > { %203 = sbr.rel (%p1873_p10) target bundleno = 1982 (0x7be), region = 36  ;;  %s1194_s8 = sshll.u32 (!%p1873_p10), %s1721_s30, 3 }
  0x4d   : > { %s206_s9 = scalar_lea.sflag (!%p1873_p10), [#allocation3], %s1721_s30  ;;  %s209_s10 = scalar_lea.vmem (!%p1873_p10), [#allocation2], %s1194_s8 }
  0x51   : > { %1529 = dma.done.wait (%p1874_p4), %s206_s9, 128  }
  0x52   : > { %1531 = vsyncadd (%p1874_p4), %s206_s9, 4294967168  ;;  %p1875_p8 = scmp.eq.s32.totalorder %s1624_s19, 0 }
  0x54   : > { %1533 = dma.done.wait (%p1875_p8), [#allocation6], 1024   ;;  %p1876_p3 = pmov %p1875_p8 }
  0x55   : > { %v1561_v0 = vmov 0.0   ;;  %vm1562_vm0 = vmmov 0   ;;  %v246_v1 = vld [vmem:[#allocation5 + $0x18] sm:$0xff]  ;;  %v245_v2 = vld [vmem:[#allocation5 + $0x10] sm:$0xff]  ;;  %v244_v3 = vld [vmem:[#allocation5 + $0x8] sm:$0xff]  ;;  %vm247_vm1 = vcmask 261120  }
  0x56   : > { %1535 = vsyncadd (%p1876_p3), [#allocation6], 4294966272  ;;  %1243 = vmatprep.subr.mxu0 %v1561_v0  ;;  %1251 = vmatprep.mubr.msk.f32.mxu0 %vm1562_vm0, %v1561_v0  ;;  %v243_v4 = vld [vmem:[#allocation5] sm:$0xff]  ;;  %v242_v5 = vld [vmem:[%s209_s10] sm:$0xff]  ;;  %s1563_s21 = smov 64   ;;  %s1564_s23 = smov 96  }
  0x57   : > { %1254 = vmatprep.subr.mxu1 %v1561_v0  ;;  %1256 = vmatprep.mubr.msk.f32.mxu1 %vm1562_vm0, %v1561_v0  ;;  %s1565_s29 = smov 88   ;;  %s1566_s5 = smov 120   ;;  %vm324_vm2 = vcmask 64512   ;;  %vm994_vm3 = vcmask 130048   ;;  %vm996_vm4 = vcmask 195584  }
  0x58   : > { %1244 = vmatpush3.msra.mxu0 %v246_v1  ;;  %s1567_s6 = smov 80   ;;  %s1568_s7 = smov 72  }
  0x59   : > { %1245 = vmatprep.subr.mxu0 %v1561_v0  ;;  %s1569_s12 = smov 112   ;;  %s1570_s13 = smov 104  }
  0x5a   : > { %1246 = vmatpush3.msra.mxu0 %v245_v2  ;;  %s1571_s25 = smov 56   ;;  %s1572_s26 = smov 48   ;;  %v1001_v2 = vld [vmem:[#allocation7 + $0x18] sm:$0xff] }
  0x5b   : > { %1247 = vmatprep.subr.mxu0 %v1561_v0  ;;  %s1573_s24 = smov 40   ;;  %s1574_s27 = smov 8  }
  0x5c   : > { %1248 = vmatpush3.msra.mxu0 %v244_v3  ;;  %v1000_v3 = vld [vmem:[#allocation7 + $0x10] sm:$0xff]  ;;  %s1575_s28 = smov 16   ;;  %s1576_s9 = smov 24  }
  0x5d   : > { %1249 = vmatprep.subr.mxu0 %v1561_v0  ;;  %p1877_p0 = scmp.ne.s32.totalorder %s1871_s14, 0 }
  0x5e   : > { %1250 = vmatpush3.msra.mxu0 %v243_v4  ;;  %v999_v4 = vld [vmem:[#allocation7 + $0x8] sm:$0xff] }
  0x5f   : > { %1252 = vmatmul.mubr.msk.f32.vlgmr.msra.gmra.mxu0 %vm247_vm1, %v242_v5  ;;  %1274 = vmatprep.subr.mxu0 %v1561_v0  ;;  %v998_v5 = vld [vmem:[#allocation7] sm:$0xff] }
  0x60   : > { %1276 = vmatprep.mubr.msk.f32.mxu0 %vm1562_vm0, %v1561_v0 }
 0x11f   : > { %v1748_v6 = vpop.f32.mrf.mxu0 }
 0x120   : > { %410 = vrot.lane.b32.xlu1 %v1748_v6, %s1563_s21  ;;  %322 = vrot.lane.b32.xlu0 %v1748_v6, %s1564_s23  ;;  %s1214_s23 = sshll.u32 %s1624_s19, 7  ;;  %s1577_s19 = smov [#allocation8]  }
 0x121   : > { %v1253_v7 = vpop.f32.mrf.mxu0 }
 0x124   : > { %488 = vrot.lane.b32.xlu1 %v1748_v6, %s1565_s29  ;;  %s241_s29 = scalar_lea.vmem [#allocation8], %s1194_s8 }
 0x128   : > { %486 = vrot.lane.b32.xlu1 %v1748_v6, %s1566_s5  ;;  %s1097_s5 = sshll.u32 %s241_s29, 4  ;;  %s1098_s5 = int_to_ptr.vmem [resolvable:$true] %s1097_s5 }
 0x12c   : > { %653 = vrot.lane.b32.xlu1 %v1748_v6, %s1567_s6 }
 0x192   : > { %v411_v8 = vpop.permute.xlu1 %410  ;;  %v323_v9 = vpop.permute.xlu0 %322 }
 0x193   : > { %1255 = vmatpush3.xpose.msk.msra.mxu1 %vm324_vm2, %v323_v9 }
 0x194   : > { %1259 = vmatprep.subr.mxu1 %v1561_v0 }
 0x196   : > { %v489_v10 = vpop.permute.xlu1 %488  ;;  %1257 = vmatmul.mubr.msk.f32.vlgmr.msra.gmra.mxu1 %vm324_vm2, %v1748_v6 }
 0x197   : > { %1260 = vmatpush3.msra.mxu1 %v411_v8  ;;  %1261 = vmatprep.mubr.msk.f32.mxu1 %vm1562_vm0, %v1561_v0 }
 0x198   : > { %1264 = vmatprep.subr.mxu1 %v1561_v0 }
 0x19a   : > { %v487_v11 = vpop.permute.xlu1 %486 }
 0x19e   : > { %v654_v12 = vpop.permute.xlu1 %653 }
 0x19f   : > { %1275 = vmatpush3.xpose.msk.msra.mxu0 %vm324_vm2, %v654_v12 }
 0x1a0   : > { %1284 = vmatprep.subr.mxu0 %v1561_v0 }
 0x256   : > { %v395_v13 = vpop.f32.mrf.mxu1 }
 0x257   : > { %v399_v14 = vsel %vm324_vm2, %v395_v13, -inf }
 0x258   : > { %400 = vmax.xlane.f32.xlu0 %v399_v14  ;;  %v1258_v15 = vpop.f32.mrf.mxu1 }
 0x26e   : > { %818 = vrot.lane.b32.xlu0 %v1748_v6, %s1568_s7 }
 0x2e1   : > { %v401_v16 = vpop.xlane.xlu0 %400 }
 0x2e2   : > { %v402_v17 = vsub.f32 %v395_v13, %v401_v16 }
 0x2e4   : > { %v403_v18 = vmul.f32 1.442695, %v402_v17  ;;  %v1211_v17 = vld [vmem:[%s1860_s3] ss:$0 sm:$0xff] }
 0x2e5   : > { %v819_v23 = vpop.permute.xlu0 %818 }
 0x2e6   : > { %1390 = vpow2.f32 %v403_v18 }
 0x2f3   : > { %v1391_v19 = vpop.eup %1390 }
 0x2f4   : > { %v405_v20 = vsel %vm324_vm2, %v1391_v19, 0.0 }
 0x2f5   : > { %406 = vadd.xlane.f32.xlu1 %v405_v20 }
 0x306   : > { %651 = vrot.lane.b32.xlu1 %v1748_v6, %s1569_s12  ;;  %s1820_s12 = scalar_lea.hbm %s1861_s4, %s1214_s23 }
 0x30a   : > { %816 = vrot.lane.b32.xlu1 %v1748_v6, %s1570_s13  ;;  %s1084_s13 = scalar_lea.sflag [#allocation4], %s1721_s30 }
 0x37e   : > { %v407_v21 = vpop.xlane.xlu1 %406 }
 0x37f   : > { %1392 = vrcp.f32 %v407_v21 }
 0x382   : > { %v652_v22 = vpop.permute.xlu1 %651 }
 0x383   : > { %1277 = vmatmul.mubr.msk.f32.vlgmr.msra.gmra.mxu0 %vm324_vm2, %v652_v22 }
 0x384   : > { %1285 = vmatpush3.xpose.msk.msra.mxu0 %vm324_vm2, %v819_v23  ;;  %1286 = vmatprep.mubr.msk.f32.mxu0 %vm1562_vm0, %v1561_v0 }
 0x385   : > { %1294 = vmatprep.subr.mxu0 %v1561_v0 }
 0x386   : > { %v817_v24 = vpop.permute.xlu1 %816 }
 0x387   : > { %1287 = vmatmul.mubr.msk.f32.vlgmr.msra.gmra.mxu0 %vm324_vm2, %v817_v24 }
 0x388   : > { %1302 = vmatprep.mubr.msk.f32.mxu0 %vm1562_vm0, %v1561_v0  ;;  %1295 = vmatpush3.msra.mxu0 %v1001_v2 }
 0x389   : > { %1296 = vmatprep.subr.mxu0 %v1561_v0 }
 0x38a   : > { %1297 = vmatpush3.msra.mxu0 %v1000_v3 }
 0x38b   : > { %1298 = vmatprep.subr.mxu0 %v1561_v0 }
 0x38c   : > { %v1393_v25 = vpop.eup %1392  ;;  %1299 = vmatpush3.msra.mxu0 %v999_v4 }
 0x38d   : > { %v409_v26 = vmul.f32 %v1393_v25, %v1391_v19  ;;  %1300 = vmatprep.subr.mxu0 %v1561_v0 }
 0x38e   : > { %1301 = vmatpush3.msra.mxu0 %v998_v5 }
 0x38f   : > { %1262 = vmatmul.mubr.msk.f32.vlgmr.msra.gmra.mxu1 %vm324_vm2, %v409_v26 }
 0x390   : > { %1265 = vmatpush3.xpose.msk.msra.mxu1 %vm324_vm2, %v489_v10  ;;  %1266 = vmatprep.mubr.msk.f32.mxu1 %vm1562_vm0, %v1561_v0 }
 0x391   : > { %1269 = vmatprep.subr.mxu1 %v1561_v0 }
 0x393   : > { %1267 = vmatmul.mubr.msk.f32.vlgmr.msra.gmra.mxu1 %vm324_vm2, %v487_v11 }
 0x394   : > { %1271 = vmatprep.mubr.msk.f32.mxu1 %vm1562_vm0, %v1561_v0 }
 0x443   : > { %v725_v27 = vpop.f32.mrf.mxu0 }
 0x444   : > { %v729_v28 = vsel %vm324_vm2, %v725_v27, -inf }
 0x445   : > { %730 = vmax.xlane.f32.xlu0 %v729_v28  ;;  %v1278_v29 = vpop.f32.mrf.mxu0 }
 0x447   : > { %v890_v30 = vpop.f32.mrf.mxu0 }
 0x448   : > { %v894_v37 = vsel %vm324_vm2, %v890_v30, -inf }
 0x449   : > { %v1288_v31 = vpop.f32.mrf.mxu0 }
 0x44f   : > { %v1786_v32 = vpop.f32.mrf.mxu1 }
 0x451   : > { %v1263_v33 = vpop.f32.mrf.mxu1 }
 0x453   : > { %v560_v34 = vpop.f32.mrf.mxu1 }
 0x454   : > { %v564_v35 = vsel %vm324_vm2, %v560_v34, -inf }
 0x455   : > { %565 = vmax.xlane.f32.xlu1 %v564_v35  ;;  %v1268_v36 = vpop.f32.mrf.mxu1 }
 0x459   : > { %895 = vmax.xlane.f32.xlu1 %v894_v37 }
 0x4ce   : > { %v731_v38 = vpop.xlane.xlu0 %730 }
 0x4cf   : > { %v732_v39 = vsub.f32 %v725_v27, %v731_v38 }
 0x4d1   : > { %v733_v40 = vmul.f32 1.442695, %v732_v39 }
 0x4d3   : > { %1394 = vpow2.f32 %v733_v40 }
 0x4de   : > { %v566_v41 = vpop.xlane.xlu1 %565 }
 0x4df   : > { %v567_v49 = vsub.f32 %v560_v34, %v566_v41 }
 0x4e0   : > { %v1395_v42 = vpop.eup %1394 }
 0x4e1   : > { %v735_v43 = vsel %vm324_vm2, %v1395_v42, 0.0  ;;  %v568_v50 = vmul.f32 1.442695, %v567_v49 }
 0x4e2   : > { %736 = vadd.xlane.f32.xlu1 %v735_v43  ;;  %v896_v44 = vpop.xlane.xlu1 %895 }
 0x4e3   : > { %v897_v45 = vsub.f32 %v890_v30, %v896_v44 }
 0x4e5   : > { %v898_v46 = vmul.f32 1.442695, %v897_v45 }
 0x4e7   : > { %1396 = vpow2.f32 %v898_v46 }
 0x4e8   : > { %1398 = vpow2.f32 %v568_v50 }
 0x4f3   : > { %575 = vrot.lane.b32.xlu1 %v1748_v6, %s1571_s25  ;;  %s1486_s25 = scalar_lea.vmem %s1098_s5, 128 }
 0x4f4   : > { %v1397_v47 = vpop.eup %1396  ;;  %p1487_p11 = scmp.ne.s32.totalorder %s1098_s5, %s1486_s25 }
 0x4f5   : > { %v900_v48 = vsel %vm324_vm2, %v1397_v47, 0.0  ;;  %v1399_v51 = vpop.eup %1398 }
 0x4f6   : > { %901 = vadd.xlane.f32.xlu0 %v900_v48  ;;  %v570_v52 = vsel %vm324_vm2, %v1399_v51, 0.0  ;;  %p1488_p1 = pnand %p1487_p11, %p1877_p0 }
 0x4f8   : > { %p1489_p2 = pneg %p1488_p1 }
 0x50c   : > { %740 = vrot.lane.b32.xlu0 %v1748_v6, %s1572_s26  ;;  %s1490_s26 = sshll.u32 %s1577_s19, 4  ;;  %s1491_s26 = int_to_ptr.vmem [resolvable:$false] %s1490_s26 }
 0x50d   : > { %s1492_s8 = scalar_lea.vmem %s1491_s26, 256  ;;  %p1493_p6 = scmp.lt.s32.totalorder %s1098_s5, %s1491_s26 }
 0x50e   : > { %p1494_p12 = scmp.lt.s32.totalorder %s1492_s8, %s1486_s25 }
 0x510   : > { %p1495_p7 = por %p1494_p12, %p1493_p6 }
 0x512   : > { %p1496_p9 = pnand %p1495_p7, %p1489_p2 }
 0x517   : > { %571 = vadd.xlane.f32.xlu1 %v570_v52 }
 0x528   : > { %905 = vrot.lane.b32.xlu1 %v1748_v6, %s1573_s24 }
 0x56b   : > { %v737_v53 = vpop.xlane.xlu1 %736 }
 0x56f   : > { %v576_v54 = vpop.permute.xlu1 %575 }
 0x570   : > { %1270 = vmatpush3.msra.mxu1 %v576_v54 }
 0x571   : > { %1279 = vmatprep.subr.mxu1 %v1561_v0 }
 0x57f   : > { %v902_v56 = vpop.xlane.xlu0 %901 }
 0x583   : > { %v741_v60 = vpop.permute.xlu0 %740 }
 0x5a0   : > { %v572_v55 = vpop.xlane.xlu1 %571 }
 0x5a1   : > { %1400 = vrcp.f32 %v572_v55 }
 0x5a2   : > { %1402 = vrcp.f32 %v737_v53 }
 0x5a3   : > { %1404 = vrcp.f32 %v902_v56 }
 0x5a4   : > { %v906_v63 = vpop.permute.xlu1 %905 }
 0x5ae   : > { %v1401_v57 = vpop.eup %1400 }
 0x5af   : > { %v574_v58 = vmul.f32 %v1401_v57, %v1399_v51  ;;  %v1403_v59 = vpop.eup %1402 }
 0x5b0   : > { %v739_v61 = vmul.f32 %v1403_v59, %v1395_v42  ;;  %v1405_v62 = vpop.eup %1404 }
 0x5b1   : > { %1272 = vmatmul.mubr.msk.f32.vlgmr.msra.gmra.mxu1 %vm324_vm2, %v574_v58  ;;  %v904_v1 = vmul.f32 %v1405_v62, %v1397_v47 }
 0x5b2   : > { %1280 = vmatpush3.msra.mxu1 %v741_v60  ;;  %1281 = vmatprep.mubr.msk.f32.mxu1 %vm1562_vm0, %v1561_v0 }
 0x5b3   : > { %1289 = vmatprep.subr.mxu1 %v1561_v0 }
 0x5b5   : > { %1282 = vmatmul.mubr.msk.f32.vlgmr.msra.gmra.mxu1 %vm324_vm2, %v739_v61 }
 0x5b6   : > { %1290 = vmatpush3.msra.mxu1 %v906_v63  ;;  %1291 = vmatprep.mubr.msk.f32.mxu1 %vm1562_vm0, %v1561_v0 }
 0x5b9   : > { %1292 = vmatmul.mubr.msk.f32.vlgmr.msra.gmra.mxu1 %vm324_vm2, %v904_v1 }
 0x671   : > { %v647_v6 = vpop.f32.mrf.mxu1 }
 0x672   : > { %982 = vrot.lane.b32.xlu1 %v647_v6, %s1574_s27 }
 0x673   : > { %v1273_v7 = vpop.f32.mrf.mxu1 }
 0x675   : > { %v812_v8 = vpop.f32.mrf.mxu1 }
 0x676   : > { %986 = vrot.lane.b32.xlu0 %v812_v8, %s1575_s28 }
 0x677   : > { %v1283_v9 = vpop.f32.mrf.mxu1 }
 0x679   : > { %v977_v10 = vpop.f32.mrf.mxu1 }
 0x67a   : > { %990 = vrot.lane.b32.xlu1 %v977_v10, %s1576_s9 }
 0x67b   : > { %v1293_v11 = vpop.f32.mrf.mxu1 }
 0x6e4   : > { %v983_v12 = vpop.permute.xlu1 %982 }
 0x6e5   : > { %v993_v0 = vsel %vm324_vm2, %v1786_v32, %v983_v12 }
 0x6e8   : > { %v987_v13 = vpop.permute.xlu0 %986 }
 0x6e9   : > { %v995_v14 = vsel %vm994_vm3, %v993_v0, %v987_v13 }
 0x6ec   : > { %v991_v15 = vpop.permute.xlu1 %990 }
 0x6ed   : > { %v997_v16 = vsel %vm996_vm4, %v995_v14, %v991_v15 }
 0x6ee   : > { %1303 = vmatmul.mubr.msk.f32.vlgmr.msra.gmra.mxu0 %vm247_vm1, %v997_v16 }
 0x7ae   : > { %v1078_v18 = vpop.f32.mrf.mxu0 }
 0x7af   : > { %v1079_v19 = vadd.f32 %v1211_v17, %v1078_v18 }
 0x7b0   : > { %v1304_v20 = vpop.f32.mrf.mxu0 }
 0x7b1   : > { %1082 = vst [vmem:[%s241_s29] sm:$0xff] %v1079_v19 }
 0x7b2   : > { %1499 = shalt.err (!%p1496_p9)
}
 0x7b3   : > { %s1500_s24 = scalar_lea.hbm %s1820_s12, 128  ;;  %s1504_s28 = scalar_lea.hbm %s1861_s4, 256 }
 0x7b4   : > { %p1501_p13 = scmp.ne.s32.totalorder %s1820_s12, %s1500_s24  ;;  %p1505_p4 = scmp.lt.s32.totalorder %s1820_s12, %s1861_s4 }
 0x7b5   : > { %p1506_p8 = scmp.lt.s32.totalorder %s1504_s28, %s1500_s24 }
 0x7b6   : > { %p1502_p5 = pnand %p1501_p13, %p1877_p0 }
 0x7b7   : > { %p1507_p3 = por %p1506_p8, %p1505_p4 }
 0x7b8   : > { %p1503_p10 = pneg %p1502_p5 }
 0x7ba   : > { %p1508_p11 = pnand %p1507_p3, %p1503_p10 }
 0x7bc   : > { %1511 = shalt.err (!%p1508_p11)
}
 0x7bd   : > { %1315 = dma.vmem_to_hbm [thread:$0]  (%p1877_p0), %s1098_s5, 128, %s1820_s12, %s1084_s13  }
 0x7be PF: > { %s1109_s21 = sand.u32 1, %s1542_s15   ;;  %p1878_p1 = scmp.ne.s32.totalorder %s1867_s22, 0 }
 0x7bf   : > { %p1879_p2 = scmp.ge.s32.totalorder %s1554_s18, 2  ;;  %s1110_s23 = scalar_lea.sflag [#allocation4], %s1109_s21 }
 0x7c1   : > { %p1329_p6 = pnand %p1879_p2, %p1878_p1 }
 0x7c3   : > { %p1330_p12 = pneg %p1329_p6 }
 0x7c5   : > { %1537 = dma.done.wait (%p1330_p12), %s1110_s23, 128  }
 0x7c6   : > { %1539 = vsyncadd (%p1330_p12), %s1110_s23, 4294967168  ;;  %p18_p7 = scmp.ge.s32.totalorder %s1675_s11, 4   ;;  %s1880_s15 = smov %s1546_s16 }
 0x7c7   : > { %s1881_s16 = smov %s1550_s17  ;;  %s1882_s17 = smov %s1691_s20 }
 0x7c8   : > { %s1883_s18 = smov %s1675_s11  ;;  %20 = sbr.rel (!%p18_p7) target bundleno = 6 (0x6), region = 89 }
 0x7cd   :  { %1115 = vsyncpa [#allocation3], 1 }
 0x7ce   :  { %1117 = vsyncpa [#allocation3 + $0x1], 1 }
 0x7cf   :  { %1118 = vsyncpa [#allocation6], 1 }
 0x7d0   :  { %1119 = vsyncpa [#allocation4], 1 }
 0x7d1   :  { %1121 = vsyncpa [#allocation4 + $0x1], 1 }

</bundles_post_ra>
